<compile_context>
chip_gen: v6e
topology: v6e:2x2x1
jax: 0.10.0
libtpu: 0.0.40
codegen_flags: <defaults>
</compile_context>

<pallas_src>
import jax
import jax.numpy as jnp
from jax.experimental import pallas as pl
from jax.experimental.pallas import tpu as pltpu


def projection_head_kernel(x_ref, w1_ref, b1_ref, w2_ref, b2_ref, o_ref):
    # First linear: bf16 x bf16 -> fp32 accumulation on the MXU.
    h = jnp.dot(x_ref[...], w1_ref[...], preferred_element_type=jnp.float32)
    # Bias + ReLU in fp32 (v5e VPU has no bf16 path; fp32 elementwise is free here).
    h = jnp.maximum(h + b1_ref[...], 0.0)
    # Second linear: downcast the fp32 hidden activation to bf16 only at the MXU input.
    y = jnp.dot(h.astype(jnp.bfloat16), w2_ref[...],
                preferred_element_type=jnp.float32)
    y = jnp.maximum(y + b2_ref[...], 0.0)
    o_ref[...] = y.astype(o_ref.dtype)


def _pick_block_m(B, input_dim, hidden_dim, output_dim,
                  vmem_budget_bytes=24 * 1024 * 1024):
    """VMEM-budgeted batch tile: works under default scoped VMEM on v5e/v6e/v7x."""
    # Grid-invariant bytes: bf16 weights (single-buffered) + fp32 biases.
    fixed = 2 * (input_dim * hidden_dim + hidden_dim * output_dim) \
            + 4 * (hidden_dim + output_dim)
    # Per-row bytes: bf16 x tile (double-buffered) + fp32 out tile (double-buffered)
    # + fp32 hidden activation + fp32 pre-store output temp.
    per_row = (2 * 2 * input_dim) + (2 * 4 * output_dim) \
              + (4 * hidden_dim) + (4 * output_dim)
    budget = max(vmem_budget_bytes - fixed, per_row)
    bm = budget // per_row
    # 512-row tiles already reach ~85% of the HBM roofline; bigger adds little.
    bm = min(bm, 512, B)
    # Keep >=2 grid steps on large batches so both v7x TensorCores get work.
    if B >= 512:
        bm = min(bm, (B + 1) // 2)
    bm = max(int(bm), 1)
    if bm < B:
        # When actually tiling, keep the sublane dim a multiple of 8.
        bm = max((bm // 8) * 8, 8)
    return bm


def _estimate_vmem_bytes(block_m, input_dim, hidden_dim, output_dim,
                         single_buffer_weights):
    wbuf = 1 if single_buffer_weights else 2
    weights = wbuf * (2 * (input_dim * hidden_dim + hidden_dim * output_dim)
                      + 4 * (hidden_dim + output_dim))
    x_tiles = 2 * block_m * input_dim * 2        # bf16, double-buffered
    out_tiles = 2 * block_m * output_dim * 4     # fp32, double-buffered
    temps = block_m * hidden_dim * 4 + block_m * output_dim * 4
    return weights + x_tiles + out_tiles + temps


def _build_specs(block_m, input_dim, hidden_dim, output_dim, single_buffer_weights):
    # Grid-invariant operands (weights/biases) don't need double buffers.
    wkw = {"pipeline_mode": pl.Buffered(1)} if single_buffer_weights else {}
    in_specs = [
        pl.BlockSpec((block_m, input_dim), lambda i: (i, 0)),
        pl.BlockSpec((input_dim, hidden_dim), lambda i: (0, 0), **wkw),
        pl.BlockSpec((1, hidden_dim), lambda i: (0, 0), **wkw),
        pl.BlockSpec((hidden_dim, output_dim), lambda i: (0, 0), **wkw),
        pl.BlockSpec((1, output_dim), lambda i: (0, 0), **wkw),
    ]
    out_spec = pl.BlockSpec((block_m, output_dim), lambda i: (i, 0))
    return in_specs, out_spec


def projection_head(x, w1_t, b1, w2_t, b2, *, block_m=None):
    """x: (B, input_dim); w1_t: (input_dim, hidden); w2_t: (hidden, output)."""
    B, input_dim = x.shape
    hidden_dim = w1_t.shape[1]
    output_dim = w2_t.shape[1]

    if block_m is None:
        block_m = _pick_block_m(B, input_dim, hidden_dim, output_dim)
    block_m = min(block_m, B)

    # bf16 only at the MXU inputs; biases (and all elementwise math) stay fp32.
    x_bf = x.astype(jnp.bfloat16)
    w1_bf = w1_t.astype(jnp.bfloat16)
    w2_bf = w2_t.astype(jnp.bfloat16)
    b1_2d = b1.reshape(1, hidden_dim).astype(jnp.float32)
    b2_2d = b2.reshape(1, output_dim).astype(jnp.float32)

    grid = (pl.cdiv(B, block_m),)

    def make_call(single_buffer_weights):
        in_specs, out_spec = _build_specs(
            block_m, input_dim, hidden_dim, output_dim, single_buffer_weights)
        cp_kwargs = {"dimension_semantics": ("parallel",)}
        est = _estimate_vmem_bytes(block_m, input_dim, hidden_dim, output_dim,
                                   single_buffer_weights)
        if est > 24 * 1024 * 1024:
            # Raise scoped VMEM only when needed; stay within v7x's 64 MiB physical.
            cp_kwargs["vmem_limit_bytes"] = min(int(est * 3 // 2), 48 * 1024 * 1024)
        return pl.pallas_call(
            projection_head_kernel,
            out_shape=jax.ShapeDtypeStruct((B, output_dim), x.dtype),
            grid_spec=pltpu.PrefetchScalarGridSpec(
                num_scalar_prefetch=0,
                grid=grid,
                in_specs=in_specs,
                out_specs=out_spec,
            ),
            compiler_params=pltpu.CompilerParams(**cp_kwargs),
        )

    try:
        return make_call(True)(x_bf, w1_bf, b1_2d, w2_bf, b2_2d)
    except Exception:
        # Fallback for JAX versions without BlockSpec pipeline_mode / Buffered(1).
        return make_call(False)(x_bf, w1_bf, b1_2d, w2_bf, b2_2d)


if __name__ == "__main__":
    # Small shapes consistent with the module defaults (overhead-bound at this size;
    # the tiling/bf16 wins only materialize at production batch sizes).
    batch = 8
    input_dim = 32
    hidden_dim = 256
    output_dim = 128

    key = jax.random.PRNGKey(0)
    kx, kw1, kb1, kw2, kb2 = jax.random.split(key, 5)

    x = jax.random.normal(kx, (batch, input_dim), dtype=jnp.float32)

    # PyTorch Linear shapes: weight (out, in), bias (out,).
    w1 = jax.random.normal(kw1, (hidden_dim, input_dim), dtype=jnp.float32) * 0.05
    b1 = jax.random.normal(kb1, (hidden_dim,), dtype=jnp.float32) * 0.05
    w2 = jax.random.normal(kw2, (output_dim, hidden_dim), dtype=jnp.float32) * 0.05
    b2 = jax.random.normal(kb2, (output_dim,), dtype=jnp.float32) * 0.05

    # Pre-transpose to (in, out) for the kernel.
    w1_t = w1.T
    w2_t = w2.T

    out = jax.block_until_ready(projection_head(x, w1_t, b1, w2_t, b2))

    # Reference 1: same mixed precision as the kernel (bf16 matmul inputs, fp32 acc).
    xb, w1b, w2b = (a.astype(jnp.bfloat16) for a in (x, w1_t, w2_t))
    h_ref = jnp.maximum(
        jnp.dot(xb, w1b, preferred_element_type=jnp.float32) + b1, 0.0)
    y_ref = jnp.maximum(
        jnp.dot(h_ref.astype(jnp.bfloat16), w2b,
                preferred_element_type=jnp.float32) + b2, 0.0)

    # Reference 2: full fp32, exactly the PyTorch module semantics (loose tol: bf16 MXU).
    h_fp = jnp.maximum(x @ w1.T + b1, 0.0)
    y_fp = jnp.maximum(h_fp @ w2.T + b2, 0.0)

    assert out.shape == (batch, output_dim)
    assert jnp.allclose(out, y_ref, atol=2e-3, rtol=2e-3), \
        float(jnp.max(jnp.abs(out - y_ref)))
    assert jnp.allclose(out, y_fp, atol=5e-2, rtol=5e-2), \
        float(jnp.max(jnp.abs(out - y_fp)))

    print("KERNEL_OK")
</pallas_src>

<mosaic_0001>
module attributes {stable_mosaic.version = 11 : i64} {
  func.func @projection_head_kernel(%arg0: i32, %arg1: memref<8x32xbf16, #tpu.memory_space<vmem>>, %arg2: memref<32x256xbf16, #tpu.memory_space<vmem>>, %arg3: memref<1x256xf32, #tpu.memory_space<vmem>>, %arg4: memref<256x128xbf16, #tpu.memory_space<vmem>>, %arg5: memref<1x128xf32, #tpu.memory_space<vmem>>, %arg6: memref<8x128xf32, #tpu.memory_space<vmem>>) attributes {dimension_semantics = [#tpu.dimension_semantics<parallel>], iteration_bounds = array<i64: 1>, scalar_prefetch = 0 : i64, scratch_operands = 0 : i64, tpu.core_type = #tpu.core_type<tc>, window_params = [{transform_indices = @transform_0, window_bounds = array<i64: 8, 32>}, {pipeline_mode = #tpu.pipeline_mode<synchronous>, transform_indices = @transform_1, window_bounds = array<i64: 32, 256>}, {pipeline_mode = #tpu.pipeline_mode<synchronous>, transform_indices = @transform_2, window_bounds = array<i64: 1, 256>}, {pipeline_mode = #tpu.pipeline_mode<synchronous>, transform_indices = @transform_3, window_bounds = array<i64: 256, 128>}, {pipeline_mode = #tpu.pipeline_mode<synchronous>, transform_indices = @transform_4, window_bounds = array<i64: 1, 128>}, {transform_indices = @transform_5, window_bounds = array<i64: 8, 128>}]} {
    %c0 = arith.constant 0 : index
    %c0_0 = arith.constant 0 : index
    %0 = vector.load %arg1[%c0, %c0_0] : memref<8x32xbf16, #tpu.memory_space<vmem>>, vector<8x32xbf16>
    %c0_1 = arith.constant 0 : index
    %c0_2 = arith.constant 0 : index
    %1 = vector.load %arg2[%c0_1, %c0_2] : memref<32x256xbf16, #tpu.memory_space<vmem>>, vector<32x256xbf16>
    %cst = arith.constant dense<0.000000e+00> : vector<8x256xf32>
    %2 = tpu.matmul %0, %1, %cst {dimension_numbers = #tpu.dot_dimension_numbers<[1], [0], [0], [1], [0, 0, 1, 1], [], []>} : vector<8x32xbf16>, vector<32x256xbf16>, vector<8x256xf32> -> vector<8x256xf32>
    %c0_3 = arith.constant 0 : index
    %c0_4 = arith.constant 0 : index
    %3 = vector.load %arg3[%c0_3, %c0_4] : memref<1x256xf32, #tpu.memory_space<vmem>>, vector<1x256xf32>
    %4 = vector.broadcast %3 : vector<1x256xf32> to vector<8x256xf32>
    %5 = arith.addf %2, %4 : vector<8x256xf32>
    %cst_5 = arith.constant 0.000000e+00 : f32
    %6 = vector.broadcast %cst_5 : f32 to vector<8x256xf32>
    %7 = arith.maximumf %5, %6 : vector<8x256xf32>
    %8 = arith.truncf %7 : vector<8x256xf32> to vector<8x256xbf16>
    %c0_6 = arith.constant 0 : index
    %c0_7 = arith.constant 0 : index
    %9 = vector.load %arg4[%c0_6, %c0_7] : memref<256x128xbf16, #tpu.memory_space<vmem>>, vector<256x128xbf16>
    %cst_8 = arith.constant dense<0.000000e+00> : vector<8x128xf32>
    %10 = tpu.matmul %8, %9, %cst_8 {dimension_numbers = #tpu.dot_dimension_numbers<[1], [0], [0], [1], [0, 0, 1, 1], [], []>} : vector<8x256xbf16>, vector<256x128xbf16>, vector<8x128xf32> -> vector<8x128xf32>
    %c0_9 = arith.constant 0 : index
    %c0_10 = arith.constant 0 : index
    %11 = vector.load %arg5[%c0_9, %c0_10] : memref<1x128xf32, #tpu.memory_space<vmem>>, vector<1x128xf32>
    %12 = vector.broadcast %11 : vector<1x128xf32> to vector<8x128xf32>
    %13 = arith.addf %10, %12 : vector<8x128xf32>
    %cst_11 = arith.constant 0.000000e+00 : f32
    %14 = vector.broadcast %cst_11 : f32 to vector<8x128xf32>
    %15 = arith.maximumf %13, %14 : vector<8x128xf32>
    %c0_12 = arith.constant 0 : index
    %c0_13 = arith.constant 0 : index
    %16 = vector.load %arg6[%c0_12, %c0_13] : memref<8x128xf32, #tpu.memory_space<vmem>>, vector<8x128xf32>
    tpu.vector_store %arg6[%c0_12, %c0_13], %15 {strides = array<i32>} : memref<8x128xf32, #tpu.memory_space<vmem>>, vector<8x128xf32>,
    return
  }
  func.func @transform_0(%arg0: i32) -> (i32, i32) {
    %c0_i32 = arith.constant 0 : i32
    %c0_i32_0 = arith.constant 0 : i32
    return %arg0, %c0_i32 : i32, i32
  }
  func.func @transform_1(%arg0: i32) -> (i32, i32) {
    %c0_i32 = arith.constant 0 : i32
    %c0_i32_0 = arith.constant 0 : i32
    %c0_i32_1 = arith.constant 0 : i32
    return %c0_i32, %c0_i32_0 : i32, i32
  }
  func.func @transform_2(%arg0: i32) -> (i32, i32) {
    %c0_i32 = arith.constant 0 : i32
    %c0_i32_0 = arith.constant 0 : i32
    %c0_i32_1 = arith.constant 0 : i32
    return %c0_i32, %c0_i32_0 : i32, i32
  }
  func.func @transform_3(%arg0: i32) -> (i32, i32) {
    %c0_i32 = arith.constant 0 : i32
    %c0_i32_0 = arith.constant 0 : i32
    %c0_i32_1 = arith.constant 0 : i32
    return %c0_i32, %c0_i32_0 : i32, i32
  }
  func.func @transform_4(%arg0: i32) -> (i32, i32) {
    %c0_i32 = arith.constant 0 : i32
    %c0_i32_0 = arith.constant 0 : i32
    %c0_i32_1 = arith.constant 0 : i32
    return %c0_i32, %c0_i32_0 : i32, i32
  }
  func.func @transform_5(%arg0: i32) -> (i32, i32) {
    %c0_i32 = arith.constant 0 : i32
    %c0_i32_0 = arith.constant 0 : i32
    return %arg0, %c0_i32 : i32, i32
  }
}

module attributes {stable_mosaic.version = 11 : i64} {
  func.func @projection_head_kernel(%arg0: i32, %arg1: memref<8x32xbf16, #tpu.memory_space<vmem>>, %arg2: memref<32x256xbf16, #tpu.memory_space<vmem>>, %arg3: memref<1x256xf32, #tpu.memory_space<vmem>>, %arg4: memref<256x128xbf16, #tpu.memory_space<vmem>>, %arg5: memref<1x128xf32, #tpu.memory_space<vmem>>, %arg6: memref<8x128xf32, #tpu.memory_space<vmem>>) attributes {dimension_semantics = [#tpu.dimension_semantics<parallel>], iteration_bounds = array<i64: 1>, scalar_prefetch = 0 : i64, scratch_operands = 0 : i64, tpu.core_type = #tpu.core_type<tc>, window_params = [{transform_indices = @transform_0, window_bounds = array<i64: 8, 32>}, {pipeline_mode = #tpu.pipeline_mode<synchronous>, transform_indices = @transform_1, window_bounds = array<i64: 32, 256>}, {pipeline_mode = #tpu.pipeline_mode<synchronous>, transform_indices = @transform_2, window_bounds = array<i64: 1, 256>}, {pipeline_mode = #tpu.pipeline_mode<synchronous>, transform_indices = @transform_3, window_bounds = array<i64: 256, 128>}, {pipeline_mode = #tpu.pipeline_mode<synchronous>, transform_indices = @transform_4, window_bounds = array<i64: 1, 128>}, {transform_indices = @transform_5, window_bounds = array<i64: 8, 128>}]} {
    %c0 = arith.constant 0 : index
    %c0_0 = arith.constant 0 : index
    %0 = vector.load %arg1[%c0, %c0_0] : memref<8x32xbf16, #tpu.memory_space<vmem>>, vector<8x32xbf16>
    %c0_1 = arith.constant 0 : index
    %c0_2 = arith.constant 0 : index
    %1 = vector.load %arg2[%c0_1, %c0_2] : memref<32x256xbf16, #tpu.memory_space<vmem>>, vector<32x256xbf16>
    %cst = arith.constant dense<0.000000e+00> : vector<8x256xf32>
    %2 = tpu.matmul %0, %1, %cst {dimension_numbers = #tpu.dot_dimension_numbers<[1], [0], [0], [1], [0, 0, 1, 1], [], []>} : vector<8x32xbf16>, vector<32x256xbf16>, vector<8x256xf32> -> vector<8x256xf32>
    %c0_3 = arith.constant 0 : index
    %c0_4 = arith.constant 0 : index
    %3 = vector.load %arg3[%c0_3, %c0_4] : memref<1x256xf32, #tpu.memory_space<vmem>>, vector<1x256xf32>
    %4 = vector.broadcast %3 : vector<1x256xf32> to vector<8x256xf32>
    %5 = arith.addf %2, %4 : vector<8x256xf32>
    %cst_5 = arith.constant 0.000000e+00 : f32
    %6 = vector.broadcast %cst_5 : f32 to vector<8x256xf32>
    %7 = arith.maximumf %5, %6 : vector<8x256xf32>
    %8 = arith.truncf %7 : vector<8x256xf32> to vector<8x256xbf16>
    %c0_6 = arith.constant 0 : index
    %c0_7 = arith.constant 0 : index
    %9 = vector.load %arg4[%c0_6, %c0_7] : memref<256x128xbf16, #tpu.memory_space<vmem>>, vector<256x128xbf16>
    %cst_8 = arith.constant dense<0.000000e+00> : vector<8x128xf32>
    %10 = tpu.matmul %8, %9, %cst_8 {dimension_numbers = #tpu.dot_dimension_numbers<[1], [0], [0], [1], [0, 0, 1, 1], [], []>} : vector<8x256xbf16>, vector<256x128xbf16>, vector<8x128xf32> -> vector<8x128xf32>
    %c0_9 = arith.constant 0 : index
    %c0_10 = arith.constant 0 : index
    %11 = vector.load %arg5[%c0_9, %c0_10] : memref<1x128xf32, #tpu.memory_space<vmem>>, vector<1x128xf32>
    %12 = vector.broadcast %11 : vector<1x128xf32> to vector<8x128xf32>
    %13 = arith.addf %10, %12 : vector<8x128xf32>
    %cst_11 = arith.constant 0.000000e+00 : f32
    %14 = vector.broadcast %cst_11 : f32 to vector<8x128xf32>
    %15 = arith.maximumf %13, %14 : vector<8x128xf32>
    %c0_12 = arith.constant 0 : index
    %c0_13 = arith.constant 0 : index
    %16 = vector.load %arg6[%c0_12, %c0_13] : memref<8x128xf32, #tpu.memory_space<vmem>>, vector<8x128xf32>
    tpu.vector_store %arg6[%c0_12, %c0_13], %15 {strides = array<i32>} : memref<8x128xf32, #tpu.memory_space<vmem>>, vector<8x128xf32>,
    return
  }
  func.func @transform_0(%arg0: i32) -> (i32, i32) {
    %c0_i32 = arith.constant 0 : i32
    %c0_i32_0 = arith.constant 0 : i32
    return %arg0, %c0_i32 : i32, i32
  }
  func.func @transform_1(%arg0: i32) -> (i32, i32) {
    %c0_i32 = arith.constant 0 : i32
    %c0_i32_0 = arith.constant 0 : i32
    %c0_i32_1 = arith.constant 0 : i32
    return %c0_i32, %c0_i32_0 : i32, i32
  }
  func.func @transform_2(%arg0: i32) -> (i32, i32) {
    %c0_i32 = arith.constant 0 : i32
    %c0_i32_0 = arith.constant 0 : i32
    %c0_i32_1 = arith.constant 0 : i32
    return %c0_i32, %c0_i32_0 : i32, i32
  }
  func.func @transform_3(%arg0: i32) -> (i32, i32) {
    %c0_i32 = arith.constant 0 : i32
    %c0_i32_0 = arith.constant 0 : i32
    %c0_i32_1 = arith.constant 0 : i32
    return %c0_i32, %c0_i32_0 : i32, i32
  }
  func.func @transform_4(%arg0: i32) -> (i32, i32) {
    %c0_i32 = arith.constant 0 : i32
    %c0_i32_0 = arith.constant 0 : i32
    %c0_i32_1 = arith.constant 0 : i32
    return %c0_i32, %c0_i32_0 : i32, i32
  }
  func.func @transform_5(%arg0: i32) -> (i32, i32) {
    %c0_i32 = arith.constant 0 : i32
    %c0_i32_0 = arith.constant 0 : i32
    return %arg0, %c0_i32 : i32, i32
  }
}

</mosaic_0001>

<bundles_post_ra>
// kernel: tpu_custom_call.1
= control target key start
LH: loop header
LB: loop body
LE: loop exit
PB: predicated region body
PF: predicated region fallthrough
CT: control target
= control target key end

     0   :  { %10 = vsyncpa [#allocation3], 0  ;;  %s558_s0 = inlined_call_operand.hbm [shape: bf16[8,32], index: 0, kind: input, shape index: {}]   ;;  %s559_s1 = inlined_call_operand.hbm [shape: bf16[32,256], index: 1, kind: input, shape index: {}]   ;;  %s560_s2 = inlined_call_operand.vmem [shape: f32[1,256], index: 2, kind: input, shape index: {}]   ;;  %s561_s3 = inlined_call_operand.hbm [shape: bf16[256,128], index: 3, kind: input, shape index: {}]   ;;  %s562_s4 = inlined_call_operand.vmem [shape: f32[1,128], index: 4, kind: input, shape index: {}]   ;;  %s563_s5 = inlined_call_operand.hbm [shape: f32[8,128], index: 5, kind: output, shape index: {}]  }
   0x1   :  { %11 = vsyncpa [#allocation6], 0 }
   0x2   :  { %12 = vsyncpa [#allocation4], 0  ;;  %s501_s18 = smov [#allocation5]  }
   0x3   :  { %s28_s19 = sshll.u32 %s501_s18, 4  ;;  %s29_s19 = int_to_ptr.vmem [resolvable:$true] %s28_s19 }
   0x4   :  { %s423_s20 = scalar_lea.vmem %s29_s19, 512  ;;  %p428_p1 = scmp.lt.s32.totalorder %s29_s19, %s29_s19 }
   0x5   :  { %p424_p0 = scmp.ne.s32.totalorder %s29_s19, %s423_s20  ;;  %p429_p2 = scmp.lt.s32.totalorder %s423_s20, %s423_s20 }
   0x7   :  { %p430_p3 = por %p429_p2, %p428_p1 }
   0x9   :  { %p431_p4 = pnand %p430_p3, %p424_p0 }
   0xb   :  { %434 = shalt.err (!%p431_p4)
}
   0xc   :  { %s502_s21 = smov 128   ;;  %s503_s22 = smov 8  }
   0xd   :  { %34 = dma.hbm_to_vmem [thread:$0]  %s559_s1, 512, %s29_s19, [#allocation6], %s502_s21, %s502_s21, %s503_s22  }
   0xe   :  { %s504_s25 = smov [#allocation2]   ;;  %s505_s27 = smov [#allocation7]  }
   0xf   :  { %s19_s26 = sshll.u32 %s504_s25, 4  ;;  %s42_s28 = sshll.u32 %s505_s27, 4  ;;  %s20_s26 = int_to_ptr.vmem [resolvable:$true] %s19_s26  ;;  %s43_s28 = int_to_ptr.vmem [resolvable:$true] %s42_s28 }
  0x10   :  { %s443_s29 = scalar_lea.vmem %s20_s26, 64  ;;  %p448_p6 = scmp.lt.s32.totalorder %s20_s26, %s20_s26 }
  0x11   :  { %p444_p5 = scmp.ne.s32.totalorder %s20_s26, %s443_s29  ;;  %p449_p7 = scmp.lt.s32.totalorder %s443_s29, %s443_s29 }
  0x13   :  { %p450_p8 = por %p449_p7, %p448_p6 }
  0x15   :  { %p451_p9 = pnand %p450_p8, %p444_p5 }
  0x17   :  { %454 = shalt.err (!%p451_p9)
}
  0x18   :  { %22 = dma.hbm_to_vmem [thread:$0]  %s558_s0, 64, %s20_s26, [#allocation3]  }
  0x19   :  { %s463_s7 = scalar_lea.vmem %s43_s28, 2048  ;;  %p468_p11 = scmp.lt.s32.totalorder %s43_s28, %s43_s28 }
  0x1a   :  { %p464_p10 = scmp.ne.s32.totalorder %s43_s28, %s463_s7  ;;  %p469_p12 = scmp.lt.s32.totalorder %s463_s7, %s463_s7 }
  0x1c   :  { %p470_p13 = por %p469_p12, %p468_p11 }
  0x1e   :  { %p471_p0 = pnand %p470_p13, %p464_p10 }
  0x20   :  { %474 = shalt.err (!%p471_p0)
}
  0x21   :  { %s506_s1 = smov 64   ;;  %s507_s8 = smov 4  }
  0x22   :  { %48 = dma.hbm_to_vmem [thread:$0]  %s561_s3, 2048, %s43_s28, [#allocation6], %s506_s1, %s506_s1, %s507_s8  }
  0x23   :  { %495 = dma.done.wait [#allocation3], 64  }
  0x24   :  { %496 = vsyncadd [#allocation3], 4294967232 }
  0x25   :  { %497 = dma.done.wait [#allocation6], 2560  }
  0x26   :  { %498 = vsyncadd [#allocation6], 4294964736  ;;  %v508_v0 = vmov 0   ;;  %v393_v1 = vld [vmem:[#allocation5 + $0x14] ss:$8 sps:$4 sm:$0xff]   ;;  %vm98_vm0 = vcmask 261120   ;;  %v68_v22 = vlaneseq }
  0x27   :  { %134 = vmatprep.mubr.bf16.mxu0 %v508_v0  ;;  %v395_v2 = vld [vmem:[#allocation5 + $0x10] ss:$8 sps:$4 sm:$0xff]   ;;  %114 = vmatprep.subr.bf16.mxu0 %v393_v1  ;;  %v396_v3 = vld [vmem:[#allocation5 + $0x4] ss:$8 sps:$4 sm:$0xff]   ;;  %v398_v4 = vld [vmem:[#allocation5] ss:$8 sps:$4 sm:$0xff]  }
  0x28   :  { %115 = vmatpush1.bf16.msra.mxu0 %v395_v2  ;;  %v399_v5 = vld [vmem:[#allocation7 + $0x78] sm:$0xff]   ;;  %v401_v8 = vld [vmem:[#allocation7 + $0x70] sm:$0xff]   ;;  %v403_v10 = vld [vmem:[#allocation7 + $0x68] sm:$0xff]   ;;  %v69_v23 = vshrl.u32 %v68_v22, 7 }
  0x29   :  { %116 = vmatprep.subr.bf16.mxu0 %v396_v3  ;;  %v400_v6 = vld [vmem:[#allocation7 + $0x38] sm:$0xff]   ;;  %362 = vmatprep.subr.bf16.mxu1 %v399_v5  ;;  %v402_v9 = vld [vmem:[#allocation7 + $0x30] sm:$0xff]   ;;  %v404_v11 = vld [vmem:[#allocation7 + $0x28] sm:$0xff]  }
  0x2a   :  { %v61_v7 = vld [vmem:[#allocation2] sm:$0xf]  ;;  %363 = vmatpush3.bf16.msra.mxu1 %v400_v6  ;;  %v405_v12 = vld [vmem:[#allocation7 + $0x60] sm:$0xff]   ;;  %v409_v16 = vld [vmem:[#allocation7 + $0x50] sm:$0xff]   ;;  %v70_v24 = vsub.s32 0, %v69_v23  ;;  %v74_v26 = vsub.s32 1, %v69_v23 }
  0x2b   :  { %364 = vmatprep.subr.bf16.mxu1 %v401_v8  ;;  %v406_v13 = vld [vmem:[#allocation7 + $0x20] sm:$0xff]   ;;  %v407_v14 = vld [vmem:[#allocation7 + $0x58] sm:$0xff]   ;;  %v410_v17 = vld [vmem:[#allocation7 + $0x10] sm:$0xff]  }
  0x2c   :  { %117 = vmatpush1.bf16.msra.mxu0 %v398_v4  ;;  %v408_v15 = vld [vmem:[#allocation7 + $0x18] sm:$0xff]   ;;  %v411_v18 = vld [vmem:[#allocation7 + $0x48] sm:$0xff]   ;;  %v413_v20 = vld [vmem:[#allocation7 + $0x40] sm:$0xff]  }
  0x2d   :  { %v412_v19 = vld [vmem:[#allocation7 + $0x8] sm:$0xff]   ;;  %v414_v21 = vld [vmem:[#allocation7] sm:$0xff]   ;;  %v66_v25 = vld [vmem:[%s560_s2] sm:$0x3]  ;;  %s509_s2 = smov [#allocation8]  }
  0x2e   :  { %365 = vmatpush3.bf16.msra.mxu1 %v402_v9  ;;  %v71_v27 = vrot.slane %v66_v25, %v70_v24  ;;  %v75_v28 = vrot.slane %v66_v25, %v74_v26  ;;  %v345_v40 = vld [vmem:[%s562_s4] ss:$0 sm:$0xff]  ;;  %s330_s13 = sshll.u32 %s509_s2, 4  ;;  %s331_s13 = int_to_ptr.vmem [resolvable:$true] %s330_s13 }
  0x2f   :  { %344 = vmatmul.mubr.msk.bf16.vlgmr.msra.gmra.mxu0 %vm98_vm0, %v61_v7  ;;  %366 = vmatprep.subr.bf16.mxu1 %v403_v10  ;;  %s475_s14 = scalar_lea.vmem %s331_s13, 128  ;;  %p480_p2 = scmp.lt.s32.totalorder %s331_s13, %s331_s13 }
  0x30   :  { %p476_p1 = scmp.ne.s32.totalorder %s331_s13, %s475_s14  ;;  %p481_p3 = scmp.lt.s32.totalorder %s475_s14, %s475_s14 }
  0x32   :  { %367 = vmatpush3.bf16.msra.mxu1 %v404_v11  ;;  %p482_p4 = por %p481_p3, %p480_p2 }
  0x33   :  { %368 = vmatprep.subr.bf16.mxu1 %v405_v12 }
  0x34   :  { %p483_p5 = pnand %p482_p4, %p476_p1 }
  0x36   :  { %369 = vmatpush3.bf16.msra.mxu1 %v406_v13 }
  0x37   :  { %370 = vmatprep.subr.bf16.mxu1 %v407_v14 }
  0x3a   :  { %371 = vmatpush3.bf16.msra.mxu1 %v408_v15 }
  0x3b   :  { %372 = vmatprep.subr.bf16.mxu1 %v409_v16 }
  0x3e   :  { %373 = vmatpush3.bf16.msra.mxu1 %v410_v17 }
  0x3f   :  { %374 = vmatprep.subr.bf16.mxu1 %v411_v18 }
  0x42   :  { %375 = vmatpush3.bf16.msra.mxu1 %v412_v19 }
  0x43   :  { %376 = vmatprep.subr.bf16.mxu1 %v413_v20 }
  0x46   :  { %377 = vmatpush3.bf16.msra.mxu1 %v414_v21 }
  0xef   :  { %v136_v29 = vpop.f32.mrf.mxu0 }
  0xf0   :  { %v137_v30 = vadd.f32 %v136_v29, %v71_v27 }
  0xf1   :  { %v138_v31 = vpop.f32.mrf.mxu0 }
  0xf2   :  { %v139_v32 = vadd.f32 %v138_v31, %v75_v28  ;;  %v143_v33 = vmax.f32 %v137_v30, 0.0 }
  0xf3   :  { %v140_v34 = vpop.f32.mrf.mxu0 }
  0xf4   :  { %v144_v35 = vmax.f32 %v139_v32, 0.0  ;;  %v145_v38 = vpack.c.bf16 %v143_v33, %v143_v33 }
  0xf5   :  { %v141_v36 = vpop.f32.mrf.mxu0 }
  0xf6   :  { %v146_v37 = vpack.c.bf16 %v144_v35, %v144_v35 }
  0xf8   :  { %314 = vmatprep.mubr.bf16.mxu1 %v146_v37 }
  0xf9   :  { %315 = vmatmul.mubr.bf16.vlgmr.msra.gmra.mxu1 %v145_v38 }
 0x1b9   :  { %v378_v39 = vpop.f32.mrf.mxu1 }
 0x1bb   :  { %v379_v41 = vpop.f32.mrf.mxu1 }
 0x1bc   :  { %v380_v42 = vadd.f32 %v379_v41, %v378_v39 }
 0x1bd   :  { %v381_v43 = vpop.f32.mrf.mxu1 }
 0x1be   :  { %v317_v44 = vadd.f32 %v380_v42, %v345_v40 }
 0x1bf   :  { %v382_v45 = vpop.f32.mrf.mxu1 }
 0x1c0   :  { %v322_v46 = vmax.f32 %v317_v44, 0.0 }
 0x1c2   :  { %323 = vst [vmem:[#allocation8] sm:$0xff] %v322_v46 }
 0x1c3   :  { %486 = shalt.err (!%p483_p5)
}
 0x1c4   :  { %333 = dma.vmem_to_hbm [thread:$0]  %s331_s13, 128, %s563_s5, [#allocation4]  }
 0x1c5   :  { %499 = dma.done.wait [#allocation4], 128  }
 0x1c6   :  { %500 = vsyncadd [#allocation4], 4294967168 }
 0x1c7   :  { %337 = vsyncpa [#allocation3], 1 }
 0x1c8   :  { %338 = vsyncpa [#allocation6], 1 }
 0x1c9   :  { %339 = vsyncpa [#allocation4], 1 }

// kernel: tpu_custom_call.1
= control target key start
LH: loop header
LB: loop body
LE: loop exit
PB: predicated region body
PF: predicated region fallthrough
CT: control target
= control target key end

     0   :  { %10 = vsyncpa [#allocation3], 0  ;;  %s558_s0 = inlined_call_operand.hbm [shape: bf16[8,32], index: 0, kind: input, shape index: {}]   ;;  %s559_s1 = inlined_call_operand.hbm [shape: bf16[32,256], index: 1, kind: input, shape index: {}]   ;;  %s560_s2 = inlined_call_operand.vmem [shape: f32[1,256], index: 2, kind: input, shape index: {}]   ;;  %s561_s3 = inlined_call_operand.hbm [shape: bf16[256,128], index: 3, kind: input, shape index: {}]   ;;  %s562_s4 = inlined_call_operand.vmem [shape: f32[1,128], index: 4, kind: input, shape index: {}]   ;;  %s563_s5 = inlined_call_operand.hbm [shape: f32[8,128], index: 5, kind: output, shape index: {}]  }
   0x1   :  { %11 = vsyncpa [#allocation6], 0 }
   0x2   :  { %12 = vsyncpa [#allocation4], 0  ;;  %s501_s18 = smov [#allocation5]  }
   0x3   :  { %s28_s19 = sshll.u32 %s501_s18, 4  ;;  %s29_s19 = int_to_ptr.vmem [resolvable:$true] %s28_s19 }
   0x4   :  { %s423_s20 = scalar_lea.vmem %s29_s19, 512  ;;  %p428_p1 = scmp.lt.s32.totalorder %s29_s19, %s29_s19 }
   0x5   :  { %p424_p0 = scmp.ne.s32.totalorder %s29_s19, %s423_s20  ;;  %p429_p2 = scmp.lt.s32.totalorder %s423_s20, %s423_s20 }
   0x7   :  { %p430_p3 = por %p429_p2, %p428_p1 }
   0x9   :  { %p431_p4 = pnand %p430_p3, %p424_p0 }
   0xb   :  { %434 = shalt.err (!%p431_p4)
}
   0xc   :  { %s502_s21 = smov 128   ;;  %s503_s22 = smov 8  }
   0xd   :  { %34 = dma.hbm_to_vmem [thread:$0]  %s559_s1, 512, %s29_s19, [#allocation6], %s502_s21, %s502_s21, %s503_s22  }
   0xe   :  { %s504_s25 = smov [#allocation2]   ;;  %s505_s27 = smov [#allocation7]  }
   0xf   :  { %s19_s26 = sshll.u32 %s504_s25, 4  ;;  %s42_s28 = sshll.u32 %s505_s27, 4  ;;  %s20_s26 = int_to_ptr.vmem [resolvable:$true] %s19_s26  ;;  %s43_s28 = int_to_ptr.vmem [resolvable:$true] %s42_s28 }
  0x10   :  { %s443_s29 = scalar_lea.vmem %s20_s26, 64  ;;  %p448_p6 = scmp.lt.s32.totalorder %s20_s26, %s20_s26 }
  0x11   :  { %p444_p5 = scmp.ne.s32.totalorder %s20_s26, %s443_s29  ;;  %p449_p7 = scmp.lt.s32.totalorder %s443_s29, %s443_s29 }
  0x13   :  { %p450_p8 = por %p449_p7, %p448_p6 }
  0x15   :  { %p451_p9 = pnand %p450_p8, %p444_p5 }
  0x17   :  { %454 = shalt.err (!%p451_p9)
}
  0x18   :  { %22 = dma.hbm_to_vmem [thread:$0]  %s558_s0, 64, %s20_s26, [#allocation3]  }
  0x19   :  { %s463_s7 = scalar_lea.vmem %s43_s28, 2048  ;;  %p468_p11 = scmp.lt.s32.totalorder %s43_s28, %s43_s28 }
  0x1a   :  { %p464_p10 = scmp.ne.s32.totalorder %s43_s28, %s463_s7  ;;  %p469_p12 = scmp.lt.s32.totalorder %s463_s7, %s463_s7 }
  0x1c   :  { %p470_p13 = por %p469_p12, %p468_p11 }
  0x1e   :  { %p471_p0 = pnand %p470_p13, %p464_p10 }
  0x20   :  { %474 = shalt.err (!%p471_p0)
}
  0x21   :  { %s506_s1 = smov 64   ;;  %s507_s8 = smov 4  }
  0x22   :  { %48 = dma.hbm_to_vmem [thread:$0]  %s561_s3, 2048, %s43_s28, [#allocation6], %s506_s1, %s506_s1, %s507_s8  }
  0x23   :  { %495 = dma.done.wait [#allocation3], 64  }
  0x24   :  { %496 = vsyncadd [#allocation3], 4294967232 }
  0x25   :  { %497 = dma.done.wait [#allocation6], 2560  }
  0x26   :  { %498 = vsyncadd [#allocation6], 4294964736  ;;  %v508_v0 = vmov 0   ;;  %v393_v1 = vld [vmem:[#allocation5 + $0x14] ss:$8 sps:$4 sm:$0xff]   ;;  %vm98_vm0 = vcmask 261120   ;;  %v68_v22 = vlaneseq }
  0x27   :  { %134 = vmatprep.mubr.bf16.mxu0 %v508_v0  ;;  %v395_v2 = vld [vmem:[#allocation5 + $0x10] ss:$8 sps:$4 sm:$0xff]   ;;  %114 = vmatprep.subr.bf16.mxu0 %v393_v1  ;;  %v396_v3 = vld [vmem:[#allocation5 + $0x4] ss:$8 sps:$4 sm:$0xff]   ;;  %v398_v4 = vld [vmem:[#allocation5] ss:$8 sps:$4 sm:$0xff]  }
  0x28   :  { %115 = vmatpush1.bf16.msra.mxu0 %v395_v2  ;;  %v399_v5 = vld [vmem:[#allocation7 + $0x78] sm:$0xff]   ;;  %v401_v8 = vld [vmem:[#allocation7 + $0x70] sm:$0xff]   ;;  %v403_v10 = vld [vmem:[#allocation7 + $0x68] sm:$0xff]   ;;  %v69_v23 = vshrl.u32 %v68_v22, 7 }
  0x29   :  { %116 = vmatprep.subr.bf16.mxu0 %v396_v3  ;;  %v400_v6 = vld [vmem:[#allocation7 + $0x38] sm:$0xff]   ;;  %362 = vmatprep.subr.bf16.mxu1 %v399_v5  ;;  %v402_v9 = vld [vmem:[#allocation7 + $0x30] sm:$0xff]   ;;  %v404_v11 = vld [vmem:[#allocation7 + $0x28] sm:$0xff]  }
  0x2a   :  { %v61_v7 = vld [vmem:[#allocation2] sm:$0xf]  ;;  %363 = vmatpush3.bf16.msra.mxu1 %v400_v6  ;;  %v405_v12 = vld [vmem:[#allocation7 + $0x60] sm:$0xff]   ;;  %v409_v16 = vld [vmem:[#allocation7 + $0x50] sm:$0xff]   ;;  %v70_v24 = vsub.s32 0, %v69_v23  ;;  %v74_v26 = vsub.s32 1, %v69_v23 }
  0x2b   :  { %364 = vmatprep.subr.bf16.mxu1 %v401_v8  ;;  %v406_v13 = vld [vmem:[#allocation7 + $0x20] sm:$0xff]   ;;  %v407_v14 = vld [vmem:[#allocation7 + $0x58] sm:$0xff]   ;;  %v410_v17 = vld [vmem:[#allocation7 + $0x10] sm:$0xff]  }
  0x2c   :  { %117 = vmatpush1.bf16.msra.mxu0 %v398_v4  ;;  %v408_v15 = vld [vmem:[#allocation7 + $0x18] sm:$0xff]   ;;  %v411_v18 = vld [vmem:[#allocation7 + $0x48] sm:$0xff]   ;;  %v413_v20 = vld [vmem:[#allocation7 + $0x40] sm:$0xff]  }
  0x2d   :  { %v412_v19 = vld [vmem:[#allocation7 + $0x8] sm:$0xff]   ;;  %v414_v21 = vld [vmem:[#allocation7] sm:$0xff]   ;;  %v66_v25 = vld [vmem:[%s560_s2] sm:$0x3]  ;;  %s509_s2 = smov [#allocation8]  }
  0x2e   :  { %365 = vmatpush3.bf16.msra.mxu1 %v402_v9  ;;  %v71_v27 = vrot.slane %v66_v25, %v70_v24  ;;  %v75_v28 = vrot.slane %v66_v25, %v74_v26  ;;  %v345_v40 = vld [vmem:[%s562_s4] ss:$0 sm:$0xff]  ;;  %s330_s13 = sshll.u32 %s509_s2, 4  ;;  %s331_s13 = int_to_ptr.vmem [resolvable:$true] %s330_s13 }
  0x2f   :  { %344 = vmatmul.mubr.msk.bf16.vlgmr.msra.gmra.mxu0 %vm98_vm0, %v61_v7  ;;  %366 = vmatprep.subr.bf16.mxu1 %v403_v10  ;;  %s475_s14 = scalar_lea.vmem %s331_s13, 128  ;;  %p480_p2 = scmp.lt.s32.totalorder %s331_s13, %s331_s13 }
  0x30   :  { %p476_p1 = scmp.ne.s32.totalorder %s331_s13, %s475_s14  ;;  %p481_p3 = scmp.lt.s32.totalorder %s475_s14, %s475_s14 }
  0x32   :  { %367 = vmatpush3.bf16.msra.mxu1 %v404_v11  ;;  %p482_p4 = por %p481_p3, %p480_p2 }
  0x33   :  { %368 = vmatprep.subr.bf16.mxu1 %v405_v12 }
  0x34   :  { %p483_p5 = pnand %p482_p4, %p476_p1 }
  0x36   :  { %369 = vmatpush3.bf16.msra.mxu1 %v406_v13 }
  0x37   :  { %370 = vmatprep.subr.bf16.mxu1 %v407_v14 }
  0x3a   :  { %371 = vmatpush3.bf16.msra.mxu1 %v408_v15 }
  0x3b   :  { %372 = vmatprep.subr.bf16.mxu1 %v409_v16 }
  0x3e   :  { %373 = vmatpush3.bf16.msra.mxu1 %v410_v17 }
  0x3f   :  { %374 = vmatprep.subr.bf16.mxu1 %v411_v18 }
  0x42   :  { %375 = vmatpush3.bf16.msra.mxu1 %v412_v19 }
  0x43   :  { %376 = vmatprep.subr.bf16.mxu1 %v413_v20 }
  0x46   :  { %377 = vmatpush3.bf16.msra.mxu1 %v414_v21 }
  0xef   :  { %v136_v29 = vpop.f32.mrf.mxu0 }
  0xf0   :  { %v137_v30 = vadd.f32 %v136_v29, %v71_v27 }
  0xf1   :  { %v138_v31 = vpop.f32.mrf.mxu0 }
  0xf2   :  { %v139_v32 = vadd.f32 %v138_v31, %v75_v28  ;;  %v143_v33 = vmax.f32 %v137_v30, 0.0 }
  0xf3   :  { %v140_v34 = vpop.f32.mrf.mxu0 }
  0xf4   :  { %v144_v35 = vmax.f32 %v139_v32, 0.0  ;;  %v145_v38 = vpack.c.bf16 %v143_v33, %v143_v33 }
  0xf5   :  { %v141_v36 = vpop.f32.mrf.mxu0 }
  0xf6   :  { %v146_v37 = vpack.c.bf16 %v144_v35, %v144_v35 }
  0xf8   :  { %314 = vmatprep.mubr.bf16.mxu1 %v146_v37 }
  0xf9   :  { %315 = vmatmul.mubr.bf16.vlgmr.msra.gmra.mxu1 %v145_v38 }
 0x1b9   :  { %v378_v39 = vpop.f32.mrf.mxu1 }
 0x1bb   :  { %v379_v41 = vpop.f32.mrf.mxu1 }
 0x1bc   :  { %v380_v42 = vadd.f32 %v379_v41, %v378_v39 }
 0x1bd   :  { %v381_v43 = vpop.f32.mrf.mxu1 }
 0x1be   :  { %v317_v44 = vadd.f32 %v380_v42, %v345_v40 }
 0x1bf   :  { %v382_v45 = vpop.f32.mrf.mxu1 }
 0x1c0   :  { %v322_v46 = vmax.f32 %v317_v44, 0.0 }
 0x1c2   :  { %323 = vst [vmem:[#allocation8] sm:$0xff] %v322_v46 }
 0x1c3   :  { %486 = shalt.err (!%p483_p5)
}
 0x1c4   :  { %333 = dma.vmem_to_hbm [thread:$0]  %s331_s13, 128, %s563_s5, [#allocation4]  }
 0x1c5   :  { %499 = dma.done.wait [#allocation4], 128  }
 0x1c6   :  { %500 = vsyncadd [#allocation4], 4294967168 }
 0x1c7   :  { %337 = vsyncpa [#allocation3], 1 }
 0x1c8   :  { %338 = vsyncpa [#allocation6], 1 }
 0x1c9   :  { %339 = vsyncpa [#allocation4], 1 }

</bundles_post_ra>
